<compile_context>
chip_gen: v7x
topology: tpu7x:2x2x1
jax: 0.10.0
libtpu: 0.0.40
codegen_flags: <defaults>
</compile_context>

<pallas_src>
import functools

import jax
import jax.numpy as jnp
from jax.experimental import pallas as pl
from jax.experimental.pallas import tpu as pltpu

_LANE = 128
_SUBLANE = 8


def _round_up(a, m):
    return (a + m - 1) // m * m


def _choose_tiles(N, C_pad, F_pad, out_W, WW):
    """Pick (Nb, Wt) so the double-buffered VMEM footprint stays bounded."""
    halo_pad = _round_up(WW - 1, _LANE)
    K = WW * C_pad

    def footprint(nb, wt):
        out_wp = _round_up(out_W, wt)
        wp = out_wp + halo_pad
        return 2 * 4 * (nb * C_pad * wp      # resident x block
                        + F_pad * K          # weight slab
                        + F_pad * _LANE      # bias (padded)
                        + nb * F_pad * wt)   # output tile

    Wt = min(_round_up(out_W, _LANE), 2048)
    Nb = min(N, 8)
    budget = 24 * 1024 * 1024
    while footprint(Nb, Wt) > budget and (Nb > 1 or Wt > _LANE):
        if Nb > 1:
            Nb //= 2
        else:
            Wt = max(_LANE, Wt // 2)

    out_Wp = _round_up(out_W, Wt)
    Wp = out_Wp + halo_pad
    halo = Wt + halo_pad
    return Nb, Wt, out_Wp, Wp, halo


def _conv1d_kernel(x_ref, w_ref, b_ref, o_ref, *,
                   C_pad, WW, Wt, halo, Nb, compute_dtype):
    # x_ref: (Nb, C_pad, Wp) -- resident across the j axis (index map const in j)
    # w_ref: (F_pad, K)      -- k-major: w2[f, k*C_pad + c] = w[f, c, k]
    # b_ref: (F_pad, 1)      -- already pre-scaled by C (reference bias quirk)
    # o_ref: (Nb, F_pad, Wt)
    j = pl.program_id(1)
    start = pl.multiple_of(j * Wt, _LANE)

    # Lane-aligned, unmasked halo load for this output tile.
    xt = x_ref[:, :, pl.ds(start, halo)]            # (Nb, C_pad, halo)
    if compute_dtype is not None:
        xt = xt.astype(compute_dtype)               # cast once, before im2col

    w_mat = w_ref[...]                              # pre-cast in the wrapper
    bias = b_ref[...].astype(jnp.float32)           # (F_pad, 1)

    # im2col, k-major, sublane-aligned (C_pad % 8 == 0); Nb tiles packed along
    # the lane axis so a single deep-K matmul covers all of them.
    xcols = []
    for i in range(Nb):
        xt_i = xt[i]                                # (C_pad, halo)
        xcols.append(
            jnp.concatenate([xt_i[:, k:k + Wt] for k in range(WW)], axis=0))
    xcol = jnp.concatenate(xcols, axis=1) if Nb > 1 else xcols[0]  # (K, Nb*Wt)

    # Single MXU contraction over K = C_pad*WW, f32 accumulation.
    y = jnp.dot(w_mat, xcol, preferred_element_type=jnp.float32)  # (F_pad, Nb*Wt)
    y = y + bias                                    # bias already = C * b

    for i in range(Nb):
        o_ref[i, :, :] = y[:, i * Wt:(i + 1) * Wt].astype(o_ref.dtype)


def conv1d_forward(x, w, b, *, compute_dtype=None):
    """Pallas forward.  x: (N, C, W), w: (F, C, WW), b: (F,) -> (N, F, W-WW+1)."""
    N, C, W = x.shape
    F, Cw, WW = w.shape
    assert C == Cw
    out_W = W - WW + 1
    assert out_W >= 1

    low_precision = (compute_dtype is not None
                     and jnp.dtype(compute_dtype).itemsize < 4)
    sub_w = 16 if low_precision else _SUBLANE

    C_pad = _round_up(C, _SUBLANE)
    F_pad = _round_up(F, sub_w)
    K = WW * C_pad

    Nb, Wt, out_Wp, Wp, halo = _choose_tiles(N, C_pad, F_pad, out_W, WW)
    num_wt = out_Wp // Wt
    N_pad = _round_up(N, Nb)

    # --- wrapper-side layout plumbing (one-time) -----------------------------
    x_p = jnp.pad(x, ((0, N_pad - N), (0, C_pad - C), (0, Wp - W)))

    # k-major filter slab matching the in-kernel im2col row order, with zero
    # rows for the padded channels.
    w_cp = jnp.pad(w, ((0, 0), (0, C_pad - C), (0, 0)))            # (F, C_pad, WW)
    w2 = jnp.transpose(w_cp, (0, 2, 1)).reshape(F, K)              # [f, k*C_pad+c]
    w2 = jnp.pad(w2, ((0, F_pad - F), (0, 0)))
    if compute_dtype is not None:
        w2 = w2.astype(compute_dtype)

    # Reference adds bias once per input channel => pre-scale by C (quirk).
    b2 = (b.astype(jnp.float32) * jnp.float32(C)).reshape(F, 1)
    b2 = jnp.pad(b2, ((0, F_pad - F), (0, 0)))

    kernel = functools.partial(
        _conv1d_kernel, C_pad=C_pad, WW=WW, Wt=Wt, halo=halo, Nb=Nb,
        compute_dtype=compute_dtype)

    grid_spec = pltpu.PrefetchScalarGridSpec(
        num_scalar_prefetch=0,
        grid=(N_pad // Nb, num_wt),
        in_specs=[
            # Padded x rows; block index constant in j => stays VMEM-resident.
            pl.BlockSpec((Nb, C_pad, Wp), lambda n, j: (n, 0, 0)),
            pl.BlockSpec((F_pad, K), lambda n, j: (0, 0)),
            pl.BlockSpec((F_pad, 1), lambda n, j: (0, 0)),
        ],
        out_specs=pl.BlockSpec((Nb, F_pad, Wt), lambda n, j: (n, 0, j)),
    )

    out_padded = pl.pallas_call(
        kernel,
        out_shape=jax.ShapeDtypeStruct((N_pad, F_pad, out_Wp), x.dtype),
        grid_spec=grid_spec,
        compiler_params=pltpu.CompilerParams(
            # Shard the batch axis across TCs (v7x) so x rows stay disjoint;
            # keep the reduction-free j axis "arbitrary" to avoid duplicating
            # the resident row on both cores.
            dimension_semantics=("parallel", "arbitrary"),
            vmem_limit_bytes=40 * 1024 * 1024,
        ),
    )(x_p, w2, b2)

    if (N_pad, F_pad, out_Wp) == (N, F, out_W):
        return out_padded                       # exact shape, no HBM copy
    return out_padded[:N, :F, :out_W]


def _reference(x, w, b):
    """Plain-JAX reference: valid cross-correlation + C * bias (module quirk)."""
    N, C, W = x.shape
    F, _, WW = w.shape
    out_W = W - WW + 1
    out = jnp.zeros((N, F, out_W), dtype=x.dtype)
    for k in range(WW):
        out = out + jnp.einsum("fc,ncw->nfw", w[:, :, k], x[:, :, k:k + out_W])
    return out + (C * b)[None, :, None]


if __name__ == "__main__":
    # Small shapes consistent with the module: N=2, C=4, W=16, F=3, WW=5.
    key = jax.random.PRNGKey(0)
    kx, kw, kb = jax.random.split(key, 3)
    N, C, W = 2, 4, 16
    F, WW = 3, 5

    x = jax.random.normal(kx, (N, C, W), dtype=jnp.float32)
    w = jax.random.normal(kw, (F, C, WW), dtype=jnp.float32)   # filter Parameter
    b = jax.random.normal(kb, (F,), dtype=jnp.float32)         # bias Parameter

    out = conv1d_forward(x, w, b)          # compute_dtype=None => exact f32 path
    out = jax.block_until_ready(out)

    ref = _reference(x, w, b)
    assert out.shape == (N, F, W - WW + 1)
    assert jnp.allclose(out, ref, atol=1e-4, rtol=1e-4)

    print("KERNEL_OK")
</pallas_src>

<mosaic_0001>
module attributes {stable_mosaic.version = 11 : i64} {
  func.func @_conv1d_kernel(%arg0: i32, %arg1: i32, %arg2: memref<2x8x256xf32, #tpu.memory_space<vmem>>, %arg3: memref<8x40xf32, #tpu.memory_space<vmem>>, %arg4: memref<8x1xf32, #tpu.memory_space<vmem>>, %arg5: memref<2x8x128xf32, #tpu.memory_space<vmem>>) attributes {dimension_semantics = [#tpu.dimension_semantics<parallel>, #tpu.dimension_semantics<arbitrary>], iteration_bounds = array<i64: 1, 1>, scalar_prefetch = 0 : i64, scratch_operands = 0 : i64, tpu.core_type = #tpu.core_type<tc>, window_params = [{transform_indices = @transform_0, window_bounds = array<i64: 2, 8, 256>}, {pipeline_mode = #tpu.pipeline_mode<synchronous>, transform_indices = @transform_1, window_bounds = array<i64: 8, 40>}, {pipeline_mode = #tpu.pipeline_mode<synchronous>, transform_indices = @transform_2, window_bounds = array<i64: 8, 1>}, {transform_indices = @transform_3, window_bounds = array<i64: 2, 8, 128>}]} {
    %c128_i32 = arith.constant 128 : i32
    %0 = arith.muli %arg1, %c128_i32 : i32
    %1 = tpu.assume_multiple %0, 128 : i32
    %c0 = arith.constant 0 : index
    %c0_0 = arith.constant 0 : index
    %2 = arith.index_cast %1 : i32 to index
    %3 = vector.load %arg2[%c0, %c0_0, %2] : memref<2x8x256xf32, #tpu.memory_space<vmem>>, vector<2x8x256xf32>
    %c0_1 = arith.constant 0 : index
    %c0_2 = arith.constant 0 : index
    %4 = vector.load %arg3[%c0_1, %c0_2] : memref<8x40xf32, #tpu.memory_space<vmem>>, vector<8x40xf32>
    %c0_3 = arith.constant 0 : index
    %c0_4 = arith.constant 0 : index
    %5 = vector.load %arg4[%c0_3, %c0_4] : memref<8x1xf32, #tpu.memory_space<vmem>>, vector<8x1xf32>
    %6 = vector.extract_strided_slice %3 {offsets = [0, 0, 0], sizes = [1, 8, 256], strides = [1, 1, 1]} : vector<2x8x256xf32> to vector<1x8x256xf32>
    %7 = vector.shape_cast %6 : vector<1x8x256xf32> to vector<8x256xf32>
    %8 = vector.extract_strided_slice %7 {offsets = [0, 0], sizes = [8, 128], strides = [1, 1]} : vector<8x256xf32> to vector<8x128xf32>
    %9 = vector.extract_strided_slice %7 {offsets = [0, 1], sizes = [8, 128], strides = [1, 1]} : vector<8x256xf32> to vector<8x128xf32>
    %10 = vector.extract_strided_slice %7 {offsets = [0, 2], sizes = [8, 128], strides = [1, 1]} : vector<8x256xf32> to vector<8x128xf32>
    %11 = vector.extract_strided_slice %7 {offsets = [0, 3], sizes = [8, 128], strides = [1, 1]} : vector<8x256xf32> to vector<8x128xf32>
    %12 = vector.extract_strided_slice %7 {offsets = [0, 4], sizes = [8, 128], strides = [1, 1]} : vector<8x256xf32> to vector<8x128xf32>
    %13 = tpu.concatenate %8, %9, %10, %11, %12 in 0 : vector<8x128xf32>, vector<8x128xf32>, vector<8x128xf32>, vector<8x128xf32>, vector<8x128xf32> -> vector<40x128xf32>
    %14 = vector.extract_strided_slice %3 {offsets = [1, 0, 0], sizes = [1, 8, 256], strides = [1, 1, 1]} : vector<2x8x256xf32> to vector<1x8x256xf32>
    %15 = vector.shape_cast %14 : vector<1x8x256xf32> to vector<8x256xf32>
    %16 = vector.extract_strided_slice %15 {offsets = [0, 0], sizes = [8, 128], strides = [1, 1]} : vector<8x256xf32> to vector<8x128xf32>
    %17 = vector.extract_strided_slice %15 {offsets = [0, 1], sizes = [8, 128], strides = [1, 1]} : vector<8x256xf32> to vector<8x128xf32>
    %18 = vector.extract_strided_slice %15 {offsets = [0, 2], sizes = [8, 128], strides = [1, 1]} : vector<8x256xf32> to vector<8x128xf32>
    %19 = vector.extract_strided_slice %15 {offsets = [0, 3], sizes = [8, 128], strides = [1, 1]} : vector<8x256xf32> to vector<8x128xf32>
    %20 = vector.extract_strided_slice %15 {offsets = [0, 4], sizes = [8, 128], strides = [1, 1]} : vector<8x256xf32> to vector<8x128xf32>
    %21 = tpu.concatenate %16, %17, %18, %19, %20 in 0 : vector<8x128xf32>, vector<8x128xf32>, vector<8x128xf32>, vector<8x128xf32>, vector<8x128xf32> -> vector<40x128xf32>
    %22 = tpu.concatenate %13, %21 in 1 : vector<40x128xf32>, vector<40x128xf32> -> vector<40x256xf32>
    %cst = arith.constant dense<0.000000e+00> : vector<8x256xf32>
    %23 = tpu.matmul %4, %22, %cst {dimension_numbers = #tpu.dot_dimension_numbers<[1], [0], [0], [1], [0, 0, 1, 1], [], []>} : vector<8x40xf32>, vector<40x256xf32>, vector<8x256xf32> -> vector<8x256xf32>
    %24 = vector.broadcast %5 : vector<8x1xf32> to vector<8x256xf32>
    %25 = arith.addf %23, %24 : vector<8x256xf32>
    %26 = vector.extract_strided_slice %25 {offsets = [0, 0], sizes = [8, 128], strides = [1, 1]} : vector<8x256xf32> to vector<8x128xf32>
    %c0_5 = arith.constant 0 : index
    %c0_6 = arith.constant 0 : index
    %c0_7 = arith.constant 0 : index
    %27 = vector.load %arg5[%c0_5, %c0_6, %c0_7] : memref<2x8x128xf32, #tpu.memory_space<vmem>>, vector<1x8x128xf32>
    %28 = vector.shape_cast %27 : vector<1x8x128xf32> to vector<8x128xf32>
    %29 = vector.shape_cast %26 : vector<8x128xf32> to vector<1x8x128xf32>
    tpu.vector_store %arg5[%c0_5, %c0_6, %c0_7], %29 {strides = array<i32>} : memref<2x8x128xf32, #tpu.memory_space<vmem>>, vector<1x8x128xf32>,
    %30 = vector.extract_strided_slice %25 {offsets = [0, 128], sizes = [8, 128], strides = [1, 1]} : vector<8x256xf32> to vector<8x128xf32>
    %c1 = arith.constant 1 : index
    %c0_8 = arith.constant 0 : index
    %c0_9 = arith.constant 0 : index
    %31 = vector.load %arg5[%c1, %c0_8, %c0_9] : memref<2x8x128xf32, #tpu.memory_space<vmem>>, vector<1x8x128xf32>
    %32 = vector.shape_cast %31 : vector<1x8x128xf32> to vector<8x128xf32>
    %33 = vector.shape_cast %30 : vector<8x128xf32> to vector<1x8x128xf32>
    tpu.vector_store %arg5[%c1, %c0_8, %c0_9], %33 {strides = array<i32>} : memref<2x8x128xf32, #tpu.memory_space<vmem>>, vector<1x8x128xf32>,
    return
  }
  func.func @transform_0(%arg0: i32, %arg1: i32) -> (i32, i32, i32) {
    %c0_i32 = arith.constant 0 : i32
    %c0_i32_0 = arith.constant 0 : i32
    %c0_i32_1 = arith.constant 0 : i32
    return %arg0, %c0_i32, %c0_i32_0 : i32, i32, i32
  }
  func.func @transform_1(%arg0: i32, %arg1: i32) -> (i32, i32) {
    %c0_i32 = arith.constant 0 : i32
    %c0_i32_0 = arith.constant 0 : i32
    %c0_i32_1 = arith.constant 0 : i32
    return %c0_i32, %c0_i32_0 : i32, i32
  }
  func.func @transform_2(%arg0: i32, %arg1: i32) -> (i32, i32) {
    %c0_i32 = arith.constant 0 : i32
    %c0_i32_0 = arith.constant 0 : i32
    %c0_i32_1 = arith.constant 0 : i32
    return %c0_i32, %c0_i32_0 : i32, i32
  }
  func.func @transform_3(%arg0: i32, %arg1: i32) -> (i32, i32, i32) {
    %c0_i32 = arith.constant 0 : i32
    %c0_i32_0 = arith.constant 0 : i32
    return %arg0, %c0_i32, %arg1 : i32, i32, i32
  }
}

</mosaic_0001>

<bundles_post_ra>
// kernel: tpu_custom_call.1
= control target key start
LH: loop header
LB: loop body
LE: loop exit
PB: predicated region body
PF: predicated region fallthrough
CT: control target
= control target key end

     0   :  { %8 = vsyncpa [#allocation3], 0  ;;  %s366_s0 = inlined_call_operand.hbm [shape: f32[2,8,256], index: 0, kind: input, shape index: {}]   ;;  %s367_s1 = inlined_call_operand.vmem [shape: f32[8,40], index: 1, kind: input, shape index: {}]   ;;  %s368_s2 = inlined_call_operand.vmem [shape: f32[8,1], index: 2, kind: input, shape index: {}]   ;;  %s369_s3 = inlined_call_operand.hbm [shape: f32[2,8,128], index: 3, kind: output, shape index: {}]  }
   0x1   :  { %9 = vsyncpa [#allocation4], 0  ;;  %s298_s12 = smov [#allocation2]   ;;  %s250_s16 = scalar_lea.hbm %s366_s0, 512 }
   0x2   :  { %s15_s13 = sshll.u32 %s298_s12, 4  ;;  %p251_p0 = scmp.ne.s32.totalorder %s366_s0, %s250_s16  ;;  %s16_s13 = int_to_ptr.vmem [resolvable:$true] %s15_s13 }
   0x3   :  { %p254_p1 = scmp.lt.u32.totalorder %s250_s16, %s366_s0 }
   0x5   :  { %p256_p2 = pnand %p254_p1, %p251_p0 }
   0x7   :  { %259 = shalt.err (!%p256_p2)
}
   0x8   :  { %s260_s21 = scalar_lea.vmem %s16_s13, 512  ;;  %p265_p4 = scmp.lt.s32.totalorder %s16_s13, %s16_s13 }
   0x9   :  { %p261_p3 = scmp.ne.s32.totalorder %s16_s13, %s260_s21  ;;  %p266_p5 = scmp.lt.s32.totalorder %s260_s21, %s260_s21 }
   0xb   :  { %p267_p6 = por %p266_p5, %p265_p4 }
   0xd   :  { %p268_p7 = pnand %p267_p6, %p261_p3 }
   0xf   :  { %271 = shalt.err (!%p268_p7)
}
  0x10   :  { %s299_s22 = smov 256   ;;  %s300_s23 = smov 16  }
  0x11   :  { %21 = dma.hbm_to_vmem [thread:$0]  %s366_s0, 512, %s16_s13, [#allocation3], %s299_s22, %s299_s22, %s300_s23  }
  0x12   :  { %294 = dma.done.wait [#allocation3], 512  }
  0x13   :  { %295 = vsyncadd [#allocation3], 4294966784  ;;  %v36_v0 = vld [vmem:[#allocation2 + $0x10] sm:$0xff]  ;;  %v37_v1 = vld [vmem:[#allocation2 + $0x18] sm:$0xff]  ;;  %s301_s26 = smov 126   ;;  %s302_s27 = smov 127  }
  0x14   :  { %v34_v2 = vld [vmem:[#allocation2] sm:$0xff]  ;;  %v229_v3 = vpack.i.bf16 %v37_v1, %v36_v0  ;;  %v35_v4 = vld [vmem:[#allocation2 + $0x8] sm:$0xff]  ;;  %s303_s28 = smov 125   ;;  %v304_v6 = vmov 0.0   ;;  %v305_v7 = vmov 0   ;;  %s306_s0 = smov 124  }
  0x15   :  { %v224_v5 = vpack.i.bf16 %v35_v4, %v34_v2  ;;  %169 = vmatprep.mubr.f32.mxu0 %v304_v6  ;;  %249 = vset.pattern.permute.xlu0 %v305_v7  ;;  %v39_v8 = vld [vmem:[%s368_s2] sm:$0xff]  ;;  %vm46_vm0 = vcmask 1039360   ;;  %vm53_vm1 = vcmask 1031168   ;;  %vm60_vm2 = vcmask 1022976   ;;  %s307_s5 = smov [#allocation5]  }
  0x16   :  { %230 = vrot.lane.b32.xlu1 %v229_v3, %s301_s26  ;;  %220 = vrot.lane.b32.xlu0 %v229_v3, %s302_s27  ;;  %vm67_vm3 = vcmask 1014784   ;;  %v38_v42 = vld [vmem:[%s367_s1] sm:$0xff]  ;;  %vm101_vm4 = vcmask 326656   ;;  %s184_s6 = sshll.u32 %s307_s5, 4  ;;  %s185_s6 = int_to_ptr.vmem [resolvable:$true] %s184_s6 }
  0x17   :  { %s272_s7 = scalar_lea.vmem %s185_s6, 256  ;;  %p277_p9 = scmp.lt.s32.totalorder %s185_s6, %s185_s6 }
  0x18   :  { %p273_p8 = scmp.ne.s32.totalorder %s185_s6, %s272_s7  ;;  %p278_p10 = scmp.lt.s32.totalorder %s272_s7, %s272_s7 }
  0x1a   :  { %235 = vrot.lane.b32.xlu1 %v229_v3, %s303_s28  ;;  %225 = vrot.lane.b32.xlu0 %v224_v5, %s302_s27  ;;  %p279_p11 = por %p278_p10, %p277_p9 }
  0x1c   :  { %p280_p12 = pnand %p279_p11, %p273_p8 }
  0x1e   :  { %245 = vrot.lane.b32.xlu1 %v224_v5, %s303_s28  ;;  %240 = vrot.lane.b32.xlu0 %v224_v5, %s301_s26 }
  0x22   :  { %92 = vrot.lane.b32.xlu1 %v37_v1, %s306_s0  ;;  %90 = vrot.lane.b32.xlu0 %v36_v0, %s306_s0 }
  0x26   :  { %65 = vrot.lane.b32.xlu1 %v35_v4, %s306_s0  ;;  %63 = vrot.lane.b32.xlu0 %v34_v2, %s306_s0 }
  0x2a   :  { %98 = vperm.xlu0 %249, %v39_v8  }
  0x88   :  { %v231_v9 = vpop.permute.xlu1 %230  ;;  %v221_v10 = vpop.permute.xlu0 %220 }
  0x89   :  { %v223_v11 = vunpack.i.h.bf16 %v221_v10  ;;  %v222_v12 = vunpack.i.l.bf16 %v221_v10  ;;  %v233_v13 = vunpack.i.h.bf16 %v231_v9  ;;  %v232_v14 = vunpack.i.l.bf16 %v231_v9 }
  0x8b   :  { %v76_v15 = vsel %vm46_vm0, %v222_v12, %v223_v11  ;;  %v82_v24 = vsel %vm53_vm1, %v232_v14, %v233_v13 }
  0x8c   :  { %v236_v16 = vpop.permute.xlu1 %235  ;;  %v226_v17 = vpop.permute.xlu0 %225  ;;  %v199_v18 = vpack.c.bf16 %v76_v15, %v36_v0 }
  0x8d   :  { %v238_v19 = vunpack.i.h.bf16 %v236_v16  ;;  %v237_v20 = vunpack.i.l.bf16 %v236_v16  ;;  %v228_v21 = vunpack.i.h.bf16 %v226_v17  ;;  %v227_v22 = vunpack.i.l.bf16 %v226_v17 }
  0x8e   :  { %200 = vmatprep.subr.bf16.mxu0 %v199_v18 }
  0x8f   :  { %v47_v23 = vsel %vm46_vm0, %v227_v22, %v228_v21  ;;  %v88_v25 = vsel %vm60_vm2, %v237_v20, %v238_v19 }
  0x90   :  { %v246_v26 = vpop.permute.xlu1 %245  ;;  %v241_v27 = vpop.permute.xlu0 %240  ;;  %v201_v28 = vpack.c.bf16 %v47_v23, %v34_v2  ;;  %v203_v29 = vpack.c.bf16 %v88_v25, %v82_v24 }
  0x91   :  { %v248_v30 = vunpack.i.h.bf16 %v246_v26  ;;  %v247_v31 = vunpack.i.l.bf16 %v246_v26  ;;  %v243_v32 = vunpack.i.h.bf16 %v241_v27  ;;  %v242_v33 = vunpack.i.l.bf16 %v241_v27 }
  0x92   :  { %202 = vmatpush1.bf16.msra.mxu0 %v201_v28 }
  0x93   :  { %204 = vmatprep.subr.bf16.mxu0 %v203_v29  ;;  %v54_v34 = vsel %vm53_vm1, %v242_v33, %v243_v32  ;;  %v61_v35 = vsel %vm60_vm2, %v247_v31, %v248_v30 }
  0x94   :  { %v93_v36 = vpop.permute.xlu1 %92  ;;  %v91_v37 = vpop.permute.xlu0 %90  ;;  %v205_v38 = vpack.c.bf16 %v61_v35, %v54_v34 }
  0x95   :  { %v94_v39 = vsel %vm67_vm3, %v91_v37, %v93_v36 }
  0x96   :  { %206 = vmatpush1.bf16.msra.mxu0 %v205_v38 }
  0x97   :  { %113 = vmatprep.subr.mxu0 %v94_v39 }
  0x98   :  { %v66_v40 = vpop.permute.xlu1 %65  ;;  %v64_v41 = vpop.permute.xlu0 %63 }
  0x99   :  { %v68_v43 = vsel %vm67_vm3, %v64_v41, %v66_v40 }
  0x9a   :  { %114 = vmatpush1.msra.mxu0 %v68_v43 }
  0x9b   :  { %198 = vmatmul.mubr.msk.f32.vlgmr.msra.gmra.mrb[0].mxu0 %vm101_vm4, %v38_v42 }
  0xa9   :  { %v99_v44 = vpop.permute.xlu0 %98 }
 0x16e   :  { %v171_v45 = vpop.f32.mrb[0].mxu0 }
 0x16f   :  { %v172_v46 = vadd.f32 %v171_v45, %v99_v44  ;;  %v173_v47 = vpop.f32.mrb[1].mxu0 }
 0x170   :  { %v174_v48 = vadd.f32 %v173_v47, %v99_v44 }
 0x171   :  { %176 = vst [vmem:[#allocation5] sm:$0xff] %v172_v46 }
 0x172   :  { %178 = vst [vmem:[#allocation5 + $0x8] sm:$0xff] %v174_v48 }
 0x173   :  { %283 = shalt.err (!%p280_p12)
}
 0x174   :  { %s284_s9 = scalar_lea.hbm %s369_s3, 256 }
 0x175   :  { %p285_p13 = scmp.ne.s32.totalorder %s369_s3, %s284_s9  ;;  %p288_p0 = scmp.lt.u32.totalorder %s284_s9, %s369_s3 }
 0x177   :  { %p290_p1 = pnand %p288_p0, %p285_p13 }
 0x179   :  { %293 = shalt.err (!%p290_p1)
}
 0x17a   :  { %s308_s14 = smov 128   ;;  %s309_s15 = smov 8  }
 0x17b   :  { %190 = dma.vmem_to_hbm [thread:$0]  %s185_s6, 256, %s369_s3, [#allocation4], %s308_s14, %s308_s14, %s309_s15  }
 0x17c   :  { %296 = dma.done.wait [#allocation4], 256  }
 0x17d   :  { %297 = vsyncadd [#allocation4], 4294967040 }
 0x17e   :  { %194 = vsyncpa [#allocation3], 1 }
 0x17f   :  { %195 = vsyncpa [#allocation4], 1 }

</bundles_post_ra>
